<compile_context>
chip_gen: v6e
topology: v6e:2x2x1
jax: 0.10.0
libtpu: 0.0.40
codegen_flags: <defaults>
</compile_context>

<pallas_src>
import jax
import jax.numpy as jnp
from jax.experimental import pallas as pl
from jax.experimental.pallas import tpu as pltpu


_N_FEATS = (64, 128, 256)
_OUT_LANES = 128  # lane-dense output slab width
_SUBLANES = 8     # sublane packing factor for the input reshape


def _feat_uniform_kernel(scales_ref, x1_ref, x2_ref, x3_ref, o_ref):
    """Fused FeatUniform forward (all three pyramid levels, one batch tile).

    scales_ref: (3,) f32 in SMEM, scales_ref[i] = w_i / (H_i * W_i)
    x*_ref    : (TB, 8, C*H*W/8) level features, sublane- and lane-dense
    o_ref     : (TB, 1, 128) lanes 0..2 = per-level scalars, lane 3 = their sum
    """

    def level_sum(x_ref):
        # Upcast after load; accumulate in f32 (correct on v5e/v6e/v7x).
        x = x_ref[...].astype(jnp.float32)           # (TB, 8, L)
        s = jnp.sum(x, axis=2, keepdims=True)        # lane reduce   -> (TB, 8, 1)
        return jnp.sum(s, axis=1, keepdims=True)     # sublane fold  -> (TB, 1, 1)

    # Pure add-reduce + one scalar multiply per level (uniform conv weight and
    # the 1/(H*W) spatial mean are folded into a single SMEM scalar).
    v1 = level_sum(x1_ref) * scales_ref[0]
    v2 = level_sum(x2_ref) * scales_ref[1]
    v3 = level_sum(x3_ref) * scales_ref[2]
    vsum = v1 + v2 + v3

    # Pack the four scalars-per-batch into a full-lane-width slab (unmasked store).
    lane = jax.lax.broadcasted_iota(jnp.int32, o_ref.shape, 2)
    slab = (jnp.where(lane == 0, v1, 0.0)
            + jnp.where(lane == 1, v2, 0.0)
            + jnp.where(lane == 2, v3, 0.0)
            + jnp.where(lane == 3, vsum, 0.0))
    o_ref[...] = slab


def make_feat_uniform_weights():
    """Deterministic parameter init exactly as NetUniformLinLayer.__init__ does
    for chn_in in {64, 128, 256}: weight = ones(C)/C, shape (1, C, 1, 1)."""
    return [jnp.full((1, c, 1, 1), 1.0 / c, dtype=jnp.float32) for c in _N_FEATS]


def _pick_batch_tile(B):
    """Largest batch tile from {8,4,2,1} dividing B that still leaves >=2 grid
    steps (so v7x's two TensorCores both get work); per-step VMEM stays tiny."""
    for tb in (8, 4, 2, 1):
        if B % tb == 0 and B // tb >= 2:
            return tb
    return B  # B == 1 (or indivisible): single step


def feat_uniform_forward(diffs, weights):
    """Mirrors FeatUniform.forward (eval mode).

    diffs:   list of 3 NCHW arrays (B, C_i, H_i, W_i), C_i in (64, 128, 256).
    weights: list of 3 conv weights of shape (1, C_i, 1, 1) (uniform 1/C_i, as
             NetUniformLinLayer initializes them).
    Returns (val_out (B,1,1,1) f32, [val1, val2, val3] each (B,1) f32).
    """
    B = diffs[0].shape[0]
    xs, scales = [], []
    for d, w in zip(diffs, weights):
        b, C, H, W = d.shape
        assert b == B
        N = C * H * W
        assert N % _SUBLANES == 0 and (N // _SUBLANES) % 128 == 0
        # Sublane- and lane-dense flatten; keep native dtype (no wrapper upcast).
        xs.append(d.reshape(B, _SUBLANES, N // _SUBLANES))
        # Uniform conv weight (1/C) + spatial mean fold to one scalar per level.
        # (NetUniformLinLayer always sets a uniform weight; a per-channel weight
        #  would need a per-channel partial-reduce path instead.)
        scales.append(w.reshape(-1)[0].astype(jnp.float32) / float(H * W))
    scales = jnp.stack(scales)  # (3,) f32 -> SMEM

    TB = _pick_batch_tile(B)
    grid = (B // TB,)
    L1, L2, L3 = (x.shape[2] for x in xs)

    out = pl.pallas_call(
        _feat_uniform_kernel,
        out_shape=jax.ShapeDtypeStruct((B, 1, _OUT_LANES), jnp.float32),
        grid=grid,
        in_specs=[
            pl.BlockSpec(memory_space=pltpu.MemorySpace.SMEM),        # scales
            pl.BlockSpec((TB, _SUBLANES, L1), lambda i: (i, 0, 0)),   # level 1
            pl.BlockSpec((TB, _SUBLANES, L2), lambda i: (i, 0, 0)),   # level 2
            pl.BlockSpec((TB, _SUBLANES, L3), lambda i: (i, 0, 0)),   # level 3
        ],
        out_specs=pl.BlockSpec((TB, 1, _OUT_LANES), lambda i: (i, 0, 0)),
        compiler_params=pltpu.CompilerParams(
            dimension_semantics=("parallel",)),
    )(scales, xs[0], xs[1], xs[2])

    vals = [out[:, 0, 0:1], out[:, 0, 1:2], out[:, 0, 2:3]]   # each (B, 1)
    val_out = out[:, 0, 3:4].reshape(B, 1, 1, 1)              # (B, 1, 1, 1)
    return val_out, vals


def _reference(diffs, weights):
    """Pure-JAX reference (same math as the PyTorch module) for verification."""
    vals = []
    for d, w in zip(diffs, weights):
        wv = w.reshape(1, -1, 1, 1).astype(jnp.float32)
        conv = jnp.sum(d.astype(jnp.float32) * wv, axis=1, keepdims=True)  # (B,1,H,W)
        v = jnp.mean(jnp.mean(conv, axis=3), axis=2)                       # (B,1)
        vals.append(v)
    val = vals[0] + vals[1] + vals[2]
    return val.reshape(val.shape[0], val.shape[1], 1, 1), vals


if __name__ == "__main__":
    key = jax.random.PRNGKey(0)
    k0, k1, k2 = jax.random.split(key, 3)
    B = 2
    # Channel counts are fixed by the module (64, 128, 256); small spatial dims.
    diffs = [
        jax.random.normal(k0, (B, 64, 16, 16), dtype=jnp.float32),
        jax.random.normal(k1, (B, 128, 8, 8), dtype=jnp.float32),
        jax.random.normal(k2, (B, 256, 4, 4), dtype=jnp.float32),
    ]
    weights = make_feat_uniform_weights()

    val_out, val_out2 = feat_uniform_forward(diffs, weights)
    jax.block_until_ready(val_out)
    for v in val_out2:
        jax.block_until_ready(v)

    ref_out, ref_vals = _reference(diffs, weights)
    assert val_out.shape == (B, 1, 1, 1)
    assert all(v.shape == (B, 1) for v in val_out2)
    assert jnp.allclose(val_out, ref_out, atol=1e-5, rtol=1e-5)
    for v, rv in zip(val_out2, ref_vals):
        assert jnp.allclose(v, rv, atol=1e-5, rtol=1e-5)

    print("KERNEL_OK")
</pallas_src>

<mosaic_0001>
module attributes {stable_mosaic.version = 11 : i64} {
  func.func @_feat_uniform_kernel(%arg0: i32, %arg1: memref<3xf32, #tpu.memory_space<smem>>, %arg2: memref<1x8x2048xf32, #tpu.memory_space<vmem>>, %arg3: memref<1x8x1024xf32, #tpu.memory_space<vmem>>, %arg4: memref<1x8x512xf32, #tpu.memory_space<vmem>>, %arg5: memref<1x1x128xf32, #tpu.memory_space<vmem>>) attributes {dimension_semantics = [#tpu.dimension_semantics<parallel>], iteration_bounds = array<i64: 2>, scalar_prefetch = 0 : i64, scratch_operands = 0 : i64, tpu.core_type = #tpu.core_type<tc>, window_params = [{transform_indices = @transform_0, window_bounds = array<i64: 3>}, {transform_indices = @transform_1, window_bounds = array<i64: 1, 8, 2048>}, {transform_indices = @transform_2, window_bounds = array<i64: 1, 8, 1024>}, {transform_indices = @transform_3, window_bounds = array<i64: 1, 8, 512>}, {transform_indices = @transform_4, window_bounds = array<i64: 1, 1, 128>}]} {
    %c0 = arith.constant 0 : index
    %c0_0 = arith.constant 0 : index
    %c0_1 = arith.constant 0 : index
    %0 = vector.load %arg2[%c0, %c0_0, %c0_1] : memref<1x8x2048xf32, #tpu.memory_space<vmem>>, vector<1x8x2048xf32>
    %cst = arith.constant dense<0.000000e+00> : vector<1x8xf32>
    %1 = vector.multi_reduction <add>, %0, %cst [2] : vector<1x8x2048xf32> to vector<1x8xf32>
    %2 = vector.shape_cast %1 : vector<1x8xf32> to vector<1x8x1xf32>
    %cst_2 = arith.constant dense<0.000000e+00> : vector<1x1xf32>
    %3 = vector.multi_reduction <add>, %2, %cst_2 [1] : vector<1x8x1xf32> to vector<1x1xf32>
    %4 = vector.shape_cast %3 : vector<1x1xf32> to vector<1x1x1xf32>
    %c0_3 = arith.constant 0 : index
    %5 = memref.load %arg1[%c0_3] : memref<3xf32, #tpu.memory_space<smem>>
    %6 = vector.broadcast %5 : f32 to vector<1x1x1xf32>
    %7 = arith.mulf %4, %6 : vector<1x1x1xf32>
    %c0_4 = arith.constant 0 : index
    %c0_5 = arith.constant 0 : index
    %c0_6 = arith.constant 0 : index
    %8 = vector.load %arg3[%c0_4, %c0_5, %c0_6] : memref<1x8x1024xf32, #tpu.memory_space<vmem>>, vector<1x8x1024xf32>
    %cst_7 = arith.constant dense<0.000000e+00> : vector<1x8xf32>
    %9 = vector.multi_reduction <add>, %8, %cst_7 [2] : vector<1x8x1024xf32> to vector<1x8xf32>
    %10 = vector.shape_cast %9 : vector<1x8xf32> to vector<1x8x1xf32>
    %cst_8 = arith.constant dense<0.000000e+00> : vector<1x1xf32>
    %11 = vector.multi_reduction <add>, %10, %cst_8 [1] : vector<1x8x1xf32> to vector<1x1xf32>
    %12 = vector.shape_cast %11 : vector<1x1xf32> to vector<1x1x1xf32>
    %c1 = arith.constant 1 : index
    %13 = memref.load %arg1[%c1] : memref<3xf32, #tpu.memory_space<smem>>
    %14 = vector.broadcast %13 : f32 to vector<1x1x1xf32>
    %15 = arith.mulf %12, %14 : vector<1x1x1xf32>
    %c0_9 = arith.constant 0 : index
    %c0_10 = arith.constant 0 : index
    %c0_11 = arith.constant 0 : index
    %16 = vector.load %arg4[%c0_9, %c0_10, %c0_11] : memref<1x8x512xf32, #tpu.memory_space<vmem>>, vector<1x8x512xf32>
    %cst_12 = arith.constant dense<0.000000e+00> : vector<1x8xf32>
    %17 = vector.multi_reduction <add>, %16, %cst_12 [2] : vector<1x8x512xf32> to vector<1x8xf32>
    %18 = vector.shape_cast %17 : vector<1x8xf32> to vector<1x8x1xf32>
    %cst_13 = arith.constant dense<0.000000e+00> : vector<1x1xf32>
    %19 = vector.multi_reduction <add>, %18, %cst_13 [1] : vector<1x8x1xf32> to vector<1x1xf32>
    %20 = vector.shape_cast %19 : vector<1x1xf32> to vector<1x1x1xf32>
    %c2 = arith.constant 2 : index
    %21 = memref.load %arg1[%c2] : memref<3xf32, #tpu.memory_space<smem>>
    %22 = vector.broadcast %21 : f32 to vector<1x1x1xf32>
    %23 = arith.mulf %20, %22 : vector<1x1x1xf32>
    %24 = arith.addf %7, %15 : vector<1x1x1xf32>
    %25 = arith.addf %24, %23 : vector<1x1x1xf32>
    %26 = tpu.iota {dimensions = array<i32: 2>} : vector<1x1x128xi32>
    %c0_i32 = arith.constant 0 : i32
    %27 = vector.broadcast %c0_i32 : i32 to vector<1x1x128xi32>
    %28 = arith.cmpi eq, %26, %27 : vector<1x1x128xi32>
    %cst_14 = arith.constant 0.000000e+00 : f32
    %29 = vector.shape_cast %7 : vector<1x1x1xf32> to vector<1x1x1xf32>
    %30 = vector.broadcast %29 : vector<1x1x1xf32> to vector<1x1x128xf32>
    %31 = vector.broadcast %cst_14 : f32 to vector<1x1x128xf32>
    %32 = arith.select %28, %30, %31 : vector<1x1x128xi1>, vector<1x1x128xf32>
    %c1_i32 = arith.constant 1 : i32
    %33 = vector.broadcast %c1_i32 : i32 to vector<1x1x128xi32>
    %34 = arith.cmpi eq, %26, %33 : vector<1x1x128xi32>
    %cst_15 = arith.constant 0.000000e+00 : f32
    %35 = vector.shape_cast %15 : vector<1x1x1xf32> to vector<1x1x1xf32>
    %36 = vector.broadcast %35 : vector<1x1x1xf32> to vector<1x1x128xf32>
    %37 = vector.broadcast %cst_15 : f32 to vector<1x1x128xf32>
    %38 = arith.select %34, %36, %37 : vector<1x1x128xi1>, vector<1x1x128xf32>
    %39 = arith.addf %32, %38 : vector<1x1x128xf32>
    %c2_i32 = arith.constant 2 : i32
    %40 = vector.broadcast %c2_i32 : i32 to vector<1x1x128xi32>
    %41 = arith.cmpi eq, %26, %40 : vector<1x1x128xi32>
    %cst_16 = arith.constant 0.000000e+00 : f32
    %42 = vector.shape_cast %23 : vector<1x1x1xf32> to vector<1x1x1xf32>
    %43 = vector.broadcast %42 : vector<1x1x1xf32> to vector<1x1x128xf32>
    %44 = vector.broadcast %cst_16 : f32 to vector<1x1x128xf32>
    %45 = arith.select %41, %43, %44 : vector<1x1x128xi1>, vector<1x1x128xf32>
    %46 = arith.addf %39, %45 : vector<1x1x128xf32>
    %c3_i32 = arith.constant 3 : i32
    %47 = vector.broadcast %c3_i32 : i32 to vector<1x1x128xi32>
    %48 = arith.cmpi eq, %26, %47 : vector<1x1x128xi32>
    %cst_17 = arith.constant 0.000000e+00 : f32
    %49 = vector.shape_cast %25 : vector<1x1x1xf32> to vector<1x1x1xf32>
    %50 = vector.broadcast %49 : vector<1x1x1xf32> to vector<1x1x128xf32>
    %51 = vector.broadcast %cst_17 : f32 to vector<1x1x128xf32>
    %52 = arith.select %48, %50, %51 : vector<1x1x128xi1>, vector<1x1x128xf32>
    %53 = arith.addf %46, %52 : vector<1x1x128xf32>
    %c0_18 = arith.constant 0 : index
    %c0_19 = arith.constant 0 : index
    %c0_20 = arith.constant 0 : index
    %54 = vector.load %arg5[%c0_18, %c0_19, %c0_20] : memref<1x1x128xf32, #tpu.memory_space<vmem>>, vector<1x1x128xf32>
    tpu.vector_store %arg5[%c0_18, %c0_19, %c0_20], %53 {strides = array<i32>} : memref<1x1x128xf32, #tpu.memory_space<vmem>>, vector<1x1x128xf32>,
    return
  }
  func.func @transform_0(%arg0: i32) -> i32 {
    %c0_i32 = arith.constant 0 : i32
    %c0_i32_0 = arith.constant 0 : i32
    return %c0_i32 : i32
  }
  func.func @transform_1(%arg0: i32) -> (i32, i32, i32) {
    %c0_i32 = arith.constant 0 : i32
    %c0_i32_0 = arith.constant 0 : i32
    %c0_i32_1 = arith.constant 0 : i32
    return %arg0, %c0_i32, %c0_i32_0 : i32, i32, i32
  }
  func.func @transform_2(%arg0: i32) -> (i32, i32, i32) {
    %c0_i32 = arith.constant 0 : i32
    %c0_i32_0 = arith.constant 0 : i32
    %c0_i32_1 = arith.constant 0 : i32
    return %arg0, %c0_i32, %c0_i32_0 : i32, i32, i32
  }
  func.func @transform_3(%arg0: i32) -> (i32, i32, i32) {
    %c0_i32 = arith.constant 0 : i32
    %c0_i32_0 = arith.constant 0 : i32
    %c0_i32_1 = arith.constant 0 : i32
    return %arg0, %c0_i32, %c0_i32_0 : i32, i32, i32
  }
  func.func @transform_4(%arg0: i32) -> (i32, i32, i32) {
    %c0_i32 = arith.constant 0 : i32
    %c0_i32_0 = arith.constant 0 : i32
    %c0_i32_1 = arith.constant 0 : i32
    return %arg0, %c0_i32, %c0_i32_0 : i32, i32, i32
  }
}

</mosaic_0001>

<bundles_post_ra>
// kernel: tpu_custom_call.1
= control target key start
LH: loop header
LB: loop body
LE: loop exit
PB: predicated region body
PF: predicated region fallthrough
CT: control target
= control target key end

     0   :  { %s1077_s0 = inlined_call_operand.hbm [shape: f32[3], index: 0, kind: input, shape index: {}]   ;;  %s1078_s1 = inlined_call_operand.hbm [shape: f32[2,8,2048], index: 1, kind: input, shape index: {}]   ;;  %s1079_s2 = inlined_call_operand.hbm [shape: f32[2,8,1024], index: 2, kind: input, shape index: {}]   ;;  %s1080_s3 = inlined_call_operand.hbm [shape: f32[2,8,512], index: 3, kind: input, shape index: {}]   ;;  %s1081_s4 = inlined_call_operand.hbm [shape: f32[2,1,128], index: 4, kind: output, shape index: {}]  }
   0x1   :  { %1088 = sst [smem:[#allocation17_spill]] %s1078_s1 }
   0x2   :  { %1089 = sst [smem:[#allocation18_spill]] %s1079_s2 }
   0x3   :  { %9 = vsyncpa [#allocation5], 0 }
   0x4   :  { %10 = vsyncpa [#allocation3], 0 }
   0x5   :  { %12 = vsyncpa [#allocation3 + $0x1], 0 }
   0x6   :  { %13 = vsyncpa [#allocation8], 0 }
   0x7   :  { %15 = vsyncpa [#allocation8 + $0x1], 0 }
   0x8   :  { %16 = vsyncpa [#allocation4], 0 }
   0x9   :  { %18 = vsyncpa [#allocation4 + $0x1], 0  ;;  %s826_s15 = smov 0   ;;  %s828_s16 = smov 0  }
   0xa   :  { %s830_s17 = smov 0   ;;  %s832_s18 = smov 0  }
   0xb LB: > { %1090 = sst [smem:[#allocation15_spill]] %s790_s17  ;;  %s847_s19 = sadd.s32 1, %s794_s18   ;;  %s794_s18 = sphi %s832_s18, %s1115_s18   ;;  %s790_s17 = sphi %s830_s17, %s1112_s17   ;;  %s786_s16 = sphi %s828_s16, %s1114_s16   ;;  %s782_s15 = sphi %s826_s15, %s1113_s15  }
   0xc   : > { %s52_s20 = sadd.s32 1, %s790_s17  ;;  %s49_s21 = ssub.s32 %s794_s18, %s847_s19 }
   0xd   : > { %p1082_p0 = scmp.ne.s32.totalorder %s790_s17, %s786_s16  ;;  %p50_p1 = scmp.eq.s32.totalorder %s49_s21, 0 }
   0xe   : > { %p60_p2 = scmp.eq.s32.totalorder %s794_s18, 0  ;;  %p591_p4 = scmp.lt.s32.totalorder %s794_s18, 2 }
   0xf   : > { %s858_s22 = scalar_select %p50_p1, %s790_s17, %s52_s20  }
  0x10   : > { %p61_p5 = por %p60_p2, %p1082_p0  ;;  %s864_s23 = sand.u32 1, %s790_s17  }
  0x11   : > { %1091 = sst [smem:[#allocation16_spill]] %s858_s22  ;;  %s195_s24 = sand.u32 1, %s794_s18  }
  0x12   : > { %s541_s25 = sshll.u32 %s864_s23, 6  ;;  %p868_p6 = pnand %p591_p4, %p61_p5 }
  0x13   : > { %s558_s27 = sshll.u32 %s794_s18, 10  ;;  %s1093_s2 = sld [smem:[#allocation18_spill]] }
  0x14   : > { %s199_s5 = scalar_lea.vmem [#allocation7], %s541_s25  ;;  %s878_s7 = scalar_lea.sflag [#allocation8], %s195_s24 }
  0x15   : > { %s207_s6 = sshll.u32 %s199_s5, 4  ;;  %p884_p8 = pneg %p868_p6  ;;  %s208_s6 = int_to_ptr.vmem [resolvable:$true] %s207_s6 }
  0x19   : > { %s876_s30 = scalar_lea.hbm %s1093_s2, %s558_s27  ;;  %s632_s12 = scalar_lea.hbm %s1093_s2, 2048 }
  0x1a   : > { %s627_s8 = scalar_lea.hbm %s876_s30, 1024  ;;  %p633_p11 = scmp.lt.s32.totalorder %s876_s30, %s1093_s2 }
  0x1b   : > { %p628_p7 = scmp.ne.s32.totalorder %s876_s30, %s627_s8  ;;  %p634_p12 = scmp.lt.s32.totalorder %s632_s12, %s627_s8 }
  0x1d   : > { %p630_p9 = pnand %p884_p8, %p628_p7  ;;  %p635_p13 = por %p634_p12, %p633_p11 }
  0x1f   : > { %p631_p10 = pneg %p630_p9 }
  0x21   : > { %p636_p1 = pnand %p635_p13, %p631_p10 }
  0x23   : > { %639 = shalt.err (!%p636_p1)
}
  0x24   : > { %s640_s20 = scalar_lea.vmem %s208_s6, 1024  ;;  %s796_s21 = smov [#allocation7]  }
  0x25   : > { %p641_p2 = scmp.ne.s32.totalorder %s208_s6, %s640_s20  ;;  %s645_s24 = sshll.u32 %s796_s21, 4  ;;  %s646_s24 = int_to_ptr.vmem [resolvable:$false] %s645_s24 }
  0x26   : > { %s647_s25 = scalar_lea.vmem %s646_s24, 2048  ;;  %p648_p7 = scmp.lt.s32.totalorder %s208_s6, %s646_s24 }
  0x27   : > { %p643_p4 = pnand %p641_p2, %p884_p8  ;;  %p649_p9 = scmp.lt.s32.totalorder %s647_s25, %s640_s20 }
  0x29   : > { %p644_p5 = pneg %p643_p4  ;;  %p650_p3 = por %p649_p9, %p648_p7 }
  0x2b   : > { %p651_p0 = pnand %p650_p3, %p644_p5 }
  0x2d   : > { %654 = shalt.err (!%p651_p0)
}
  0x2e   : > { %582 = dma.hbm_to_vmem [thread:$0]  (!%p868_p6), %s876_s30, 1024, %s208_s6, %s878_s7  }
  0x2f   : > { %s904_s27 = sadd.s32 4294967295, %s794_s18   ;;  %s534_s28 = sadd.s32 4294967294, %s794_s18  }
  0x30   : > { %p65_p0 = scmp.ne.s32.totalorder %s786_s16, %s782_s15  ;;  %p1083_p3 = scmp.eq.s32.totalorder %s904_s27, 0 }
  0x31   : > { %p141_p10 = scmp.eq.s32.totalorder %s904_s27, 1  ;;  %p147_p11 = scmp.eq.s32.totalorder %s534_s28, 1 }
  0x32   : > { %p913_p12 = por %p1083_p3, %p65_p0  ;;  %p535_p13 = scmp.ge.s32.totalorder %s794_s18, 1 }
  0x33   : > { %p1096_p1 = scmp.ne.s32.totalorder %s790_s17, %s786_s16  ;;  %p925_p4 = por %p147_p11, %p65_p0 }
  0x34   : > { %s1095_s29 = scalar_select %p913_p12, 1, 0 }
  0x35   : > { %p921_p2 = por %p141_p10, %p1096_p1  ;;  %p154_p5 = scmp.lt.s32.totalorder %s794_s18, 3 }
  0x36   : > { %s1098_s5 = scalar_select %p925_p4, 1, 0 }
  0x37   : > { %s1097_s30 = scalar_select %p921_p2, 1, 0 }
  0x38   : > { %p930_p7 = pnand %p535_p13, %p154_p5  ;;  %s538_s8 = sshll.u32 %s864_s23, 7 }
  0x39   : > { %s557_s10 = sshll.u32 %s794_s18, 11  ;;  %s1100_s1 = sld [smem:[#allocation17_spill]] }
  0x3a   : > { %s1099_s6 = scalar_select %p930_p7, 1, 0 }
  0x3b   : > { %p572_p9 = pneg %p930_p7  ;;  %s180_s14 = scalar_lea.vmem [#allocation6], %s538_s8 }
  0x3c   : > { %s188_s20 = sshll.u32 %s180_s14, 4  ;;  %s177_s25 = scalar_lea.sflag [#allocation3], %s864_s23  ;;  %s189_s20 = int_to_ptr.vmem [resolvable:$true] %s188_s20 }
  0x3d   : > { %p946_p0 = pnand %p572_p9, %p1083_p3 }
  0x3f   : > { %s941_s13 = scalar_lea.hbm %s1100_s1, %s557_s10  ;;  %s660_s12 = scalar_lea.hbm %s1100_s1, 4096 }
  0x40   : > { %s1101_s24 = scalar_select %p946_p0, 1, 0 }
  0x41   : > { %s655_s28 = scalar_lea.hbm %s941_s13, 2048  ;;  %p661_p1 = scmp.lt.s32.totalorder %s941_s13, %s1100_s1 }
  0x42   : > { %p656_p10 = scmp.ne.s32.totalorder %s941_s13, %s655_s28  ;;  %p662_p5 = scmp.lt.s32.totalorder %s660_s12, %s655_s28 }
  0x44   : > { %p658_p11 = pnand %p656_p10, %p884_p8  ;;  %p663_p9 = por %p662_p5, %p661_p1 }
  0x46   : > { %p659_p13 = pneg %p658_p11 }
  0x48   : > { %p664_p3 = pnand %p663_p9, %p659_p13 }
  0x4a   : > { %667 = shalt.err (!%p664_p3)
}
  0x4b   : > { %s668_s14 = scalar_lea.vmem %s189_s20, 2048  ;;  %s797_s21 = smov [#allocation6]  }
  0x4c   : > { %p669_p4 = scmp.ne.s32.totalorder %s189_s20, %s668_s14  ;;  %s673_s22 = sshll.u32 %s797_s21, 4  ;;  %s674_s22 = int_to_ptr.vmem [resolvable:$false] %s673_s22 }
  0x4d   : > { %s675_s17 = scalar_lea.vmem %s674_s22, 4096  ;;  %p676_p10 = scmp.lt.s32.totalorder %s189_s20, %s674_s22 }
  0x4e   : > { %p671_p2 = pnand %p669_p4, %p884_p8  ;;  %p677_p11 = scmp.lt.s32.totalorder %s675_s17, %s668_s14 }
  0x50   : > { %p672_p12 = pneg %p671_p2  ;;  %p678_p7 = por %p677_p11, %p676_p10 }
  0x52   : > { %p679_p0 = pnand %p678_p7, %p672_p12 }
  0x54   : > { %682 = shalt.err (!%p679_p0)
}
  0x55   : > { %579 = dma.hbm_to_vmem [thread:$0]  (!%p868_p6), %s941_s13, 2048, %s189_s20, %s177_s25  }
  0x56   : > { %s798_s2 = smov [#allocation2]   ;;  %p1102_p3 = scmp.ne.s32.totalorder %s1101_s24, 0 }
  0x57   : > { %s559_s21 = sshll.u32 %s794_s18, 9  ;;  %s1103_s22 = sshll.u32 %s864_s23, 5 }
  0x58   : > { %575 = dma.hbm_to_smem (!%p1102_p3), %s1077_s0, 16, %s798_s2, [#allocation5]  }
  0x59   : > { %s218_s17 = scalar_lea.vmem [#allocation9], %s1103_s22  ;;  %s224_s14 = scalar_lea.hbm %s1080_s3, %s559_s21 }
  0x5a   : > { %s226_s11 = sshll.u32 %s218_s17, 4  ;;  %s694_s1 = scalar_lea.hbm %s224_s14, 512  ;;  %s227_s11 = int_to_ptr.vmem [resolvable:$true] %s226_s11 }
  0x5b   : > { %p695_p12 = scmp.ne.s32.totalorder %s224_s14, %s694_s1  ;;  %s699_s24 = scalar_lea.hbm %s1080_s3, 1024 }
  0x5c   : > { %p700_p7 = scmp.lt.s32.totalorder %s224_s14, %s1080_s3  ;;  %p701_p0 = scmp.lt.s32.totalorder %s699_s24, %s694_s1 }
  0x5d   : > { %p697_p2 = pnand %p695_p12, %p884_p8 }
  0x5e   : > { %p702_p13 = por %p701_p0, %p700_p7 }
  0x5f   : > { %p698_p4 = pneg %p697_p2 }
  0x61   : > { %p703_p1 = pnand %p702_p13, %p698_p4 }
  0x63   : > { %706 = shalt.err (!%p703_p1)
}
  0x64   : > { %s707_s23 = scalar_lea.vmem %s227_s11, 512  ;;  %s799_s28 = smov [#allocation9]  }
  0x65   : > { %p708_p5 = scmp.ne.s32.totalorder %s227_s11, %s707_s23  ;;  %s712_s10 = sshll.u32 %s799_s28, 4  ;;  %s713_s10 = int_to_ptr.vmem [resolvable:$false] %s712_s10 }
  0x66   : > { %s714_s21 = scalar_lea.vmem %s713_s10, 1024  ;;  %p715_p11 = scmp.lt.s32.totalorder %s227_s11, %s713_s10 }
  0x67   : > { %p710_p9 = pnand %p708_p5, %p884_p8  ;;  %p716_p3 = scmp.lt.s32.totalorder %s714_s21, %s707_s23 }
  0x69   : > { %p711_p10 = pneg %p710_p9  ;;  %p717_p12 = por %p716_p3, %p715_p11 }
  0x6b   : > { %p718_p2 = pnand %p717_p12, %p711_p10 }
  0x6d   : > { %721 = shalt.err (!%p718_p2)
}
  0x6e   : > { %585 = dma.hbm_to_vmem [thread:$0]  (!%p868_p6), %s224_s14, 512, %s227_s11, %s878_s7  }
  0x6f   : > { %p1104_p4 = scmp.ne.s32.totalorder %s1099_s6, 0 }
  0x70   : > { %p1105_p7 = scmp.eq.s32.totalorder (!%p1104_p4), %s904_s27, 0 }
  0x71   : > { %235 = sbr.rel (%p1104_p4) target bundleno = 337 (0x151), region = 36 }
  0x76   : > { %765 = dma.done.wait (%p1105_p7), [#allocation5], 16   ;;  %p1106_p8 = pmov %p1105_p7 }
  0x77   : > { %s998_s1 = sand.u32 1, %s786_s16   ;;  %p1107_p6 = scmp.ne.s32.totalorder %s1095_s29, 0 }
  0x78   : > { %767 = vsyncadd (%p1106_p8), [#allocation5], 4294967280  ;;  %s549_s9 = sshll.u32 %s998_s1, 7  ;;  %s242_s22 = scalar_lea.sflag [#allocation3], %s998_s1 }
  0x79   : > { %s1002_s26 = scalar_lea.vmem [#allocation6], %s549_s9 }
  0x7a   : > { %769 = dma.done.wait (%p1107_p6), %s242_s22, 2048  }
  0x7b   : > { %771 = vsyncadd (%p1107_p6), %s242_s22, 4294965248  ;;  %s250_s7 = sand.u32 1, %s904_s27   ;;  %s550_s6 = sshll.u32 %s998_s1, 6 }
  0x7c   : > { %s251_s17 = scalar_lea.sflag [#allocation8], %s250_s7  ;;  %s1010_s11 = scalar_lea.vmem [#allocation7], %s550_s6 }
  0x7d   : > { %773 = dma.done.wait (%p1107_p6), %s251_s17, 1536  }
  0x7e   : > { %775 = vsyncadd (%p1107_p6), %s251_s17, 4294965760  ;;  %s551_s12 = sshll.u32 %s998_s1, 5 }
  0x7f   : > { %s263_s8 = scalar_lea.vmem [#allocation9], %s551_s12 }
  0x80   : > { %268 = sfence }
  0x81   : > { %v366_v0 = vld [vmem:[%s263_s8] sm:$0xff]  ;;  %v367_v1 = vld [vmem:[%s263_s8 + $0x8] sm:$0xff]  ;;  %v368_v2 = vld [vmem:[%s263_s8 + $0x10] sm:$0xff]  ;;  %s337_s29 = sld [smem:[#allocation2]]  ;;  %s554_s20 = sshll.u32 %s904_s27, 4 }
  0x82   : > { %v370_v3 = vadd.f32 %v367_v1, %v366_v0  ;;  %v298_v4 = vld [vmem:[%s1002_s26] sm:$0xff]  ;;  %v299_v5 = vld [vmem:[%s1002_s26 + $0x8] sm:$0xff]  ;;  %v369_v6 = vld [vmem:[%s263_s8 + $0x18] sm:$0xff]  ;;  %s553_s14 = sld [smem:[#allocation2 + $0x2]]  ;;  %s297_s24 = scalar_lea.vmem [#allocation10], %s998_s1 }
  0x83   : > { %v300_v7 = vld [vmem:[%s1002_s26 + $0x10] sm:$0xff]  ;;  %v314_v8 = vadd.f32 %v299_v5, %v298_v4  ;;  %v301_v10 = vld [vmem:[%s1002_s26 + $0x18] sm:$0xff]  ;;  %v302_v13 = vld [vmem:[%s1002_s26 + $0x20] sm:$0xff]  ;;  %s552_s13 = sld [smem:[#allocation2 + $0x1]]  ;;  %s413_s25 = sshll.u32 %s297_s24, 4  ;;  %s414_s25 = int_to_ptr.vmem [resolvable:$true] %s413_s25 }
  0x84   : > { %v371_v9 = vadd.f32 %v370_v3, %v368_v2  ;;  %v340_v15 = vld [vmem:[%s1010_s11] sm:$0xff]  ;;  %v303_v16 = vld [vmem:[%s1002_s26 + $0x28] sm:$0xff]  ;;  %v304_v20 = vld [vmem:[%s1002_s26 + $0x30] sm:$0xff]  ;;  %v386_v2 = vlaneseq  ;;  %s411_s28 = scalar_lea.hbm %s1081_s4, %s554_s20  ;;  %s401_s10 = scalar_lea.sflag [#allocation4], %s998_s1 }
  0x85   : > { %v315_v11 = vadd.f32 %v314_v8, %v300_v7  ;;  %v341_v17 = vld [vmem:[%s1010_s11 + $0x8] sm:$0xff]  ;;  %v342_v21 = vld [vmem:[%s1010_s11 + $0x10] sm:$0xff]  ;;  %v305_v23 = vld [vmem:[%s1002_s26 + $0x38] sm:$0xff]  ;;  %s722_s21 = scalar_lea.vmem %s414_s25, 16  ;;  %p1108_p13 = scmp.ne.s32.totalorder %s1097_s30, 0 }
  0x86   : > { %v372_v12 = vadd.f32 %v371_v9, %v369_v6  ;;  %v348_v19 = vadd.f32 %v341_v17, %v340_v15  ;;  %v306_v26 = vld [vmem:[%s1002_s26 + $0x40] sm:$0xff]  ;;  %v343_v27 = vld [vmem:[%s1010_s11 + $0x18] sm:$0xff]  ;;  %v307_v29 = vld [vmem:[%s1002_s26 + $0x48] sm:$0xff]  ;;  %v387_v9 = vand.u32 127, %v386_v2  ;;  %p723_p0 = scmp.ne.s32.totalorder %s414_s25, %s722_s21  ;;  %s800_s9 = smov [#allocation10]  }
  0x87   : > { %v316_v14 = vadd.f32 %v315_v11, %v301_v10  ;;  %v308_v32 = vld [vmem:[%s1002_s26 + $0x50] sm:$0xff]  ;;  %v344_v33 = vld [vmem:[%s1010_s11 + $0x20] sm:$0xff]  ;;  %v309_v35 = vld [vmem:[%s1002_s26 + $0x58] sm:$0xff]  ;;  %v338_v8 = vstv %s337_s29  ;;  %s726_s22 = sshll.u32 %s800_s9, 4  ;;  %s727_s22 = int_to_ptr.vmem [resolvable:$false] %s726_s22 }
  0x88   : > { %373 = vadd.xlane.f32.xlu1 %v372_v12  ;;  %v349_v25 = vadd.f32 %v348_v19, %v342_v21  ;;  %v310_v38 = vld [vmem:[%s1002_s26 + $0x60] sm:$0xff]  ;;  %v345_v39 = vld [vmem:[%s1010_s11 + $0x28] sm:$0xff]  ;;  %v312_v44 = vld [vmem:[%s1002_s26 + $0x70] sm:$0xff]  ;;  %v382_v12 = vstv %s553_s14  ;;  %vm388_vm0 = vcmp.eq.s32.totalorder %v387_v9, 0  ;;  %vm390_vm1 = vcmp.eq.s32.totalorder %v387_v9, 1  ;;  %p724_p1 = pnand %p723_p0, %p1108_p13  ;;  %s728_s27 = scalar_lea.vmem %s727_s22, 32 }
  0x89   : > { %v317_v18 = vadd.f32 %v316_v14, %v302_v13  ;;  %v311_v41 = vld [vmem:[%s1002_s26 + $0x68] sm:$0xff]  ;;  %v346_v45 = vld [vmem:[%s1010_s11 + $0x30] sm:$0xff]  ;;  %v313_v47 = vld [vmem:[%s1002_s26 + $0x78] sm:$0xff]  ;;  %v364_v13 = vstv %s552_s13  ;;  %vm393_vm2 = vcmp.eq.s32.totalorder %v387_v9, 2  ;;  %vm396_vm3 = vcmp.eq.s32.totalorder %v387_v9, 3  ;;  %p729_p9 = scmp.lt.s32.totalorder %s414_s25, %s727_s22  ;;  %p730_p10 = scmp.lt.s32.totalorder %s728_s27, %s722_s21 }
  0x8a   : > { %v350_v31 = vadd.f32 %v349_v25, %v343_v27  ;;  %v347_v50 = vld [vmem:[%s1010_s11 + $0x38] sm:$0xff]  ;;  %p725_p5 = pneg %p724_p1 }
  0x8b   : > { %v318_v22 = vadd.f32 %v317_v18, %v303_v16  ;;  %p731_p11 = por %p730_p10, %p729_p9 }
  0x8c   : > { %v351_v37 = vadd.f32 %v350_v31, %v344_v33 }
  0x8d   : > { %v319_v24 = vadd.f32 %v318_v22, %v304_v20  ;;  %p732_p3 = pnand %p731_p11, %p725_p5 }
  0x8e   : > { %v352_v43 = vadd.f32 %v351_v37, %v345_v39 }
  0x8f   : > { %v320_v28 = vadd.f32 %v319_v24, %v305_v23 }
  0x90   : > { %v353_v49 = vadd.f32 %v352_v43, %v346_v45 }
  0x91   : > { %v321_v30 = vadd.f32 %v320_v28, %v306_v26 }
  0x92   : > { %v354_v52 = vadd.f32 %v353_v49, %v347_v50 }
  0x93   : > { %v322_v34 = vadd.f32 %v321_v30, %v307_v29 }
  0x95   : > { %v323_v36 = vadd.f32 %v322_v34, %v308_v32 }
  0x97   : > { %v324_v40 = vadd.f32 %v323_v36, %v309_v35 }
  0x99   : > { %v325_v42 = vadd.f32 %v324_v40, %v310_v38 }
  0x9b   : > { %v326_v46 = vadd.f32 %v325_v42, %v311_v41 }
  0x9d   : > { %v327_v48 = vadd.f32 %v326_v46, %v312_v44 }
  0x9f   : > { %v328_v51 = vadd.f32 %v327_v48, %v313_v47 }
  0xa1   : > { %329 = vadd.xlane.f32.xlu0 %v328_v51 }
  0xa5   : > { %355 = vadd.xlane.f32.xlu0 %v354_v52 }
 0x111   : > { %v374_v53 = vpop.xlane.xlu1 %373 }
 0x112   : > { %v375_v54 = vrot.slane %v374_v53, 4 }
 0x114   : > { %v376_v55 = vadd.f32 %v375_v54, %v374_v53 }
 0x116   : > { %v377_v57 = vrot.slane %v376_v55, 2 }
 0x118   : > { %v378_v61 = vadd.f32 %v377_v57, %v376_v55 }
 0x11a   : > { %v379_v3 = vrot.slane %v378_v61, 1 }
 0x11c   : > { %v380_v10 = vadd.f32 %v379_v3, %v378_v61 }
 0x11e   : > { %v383_v16 = vmul.f32 %v382_v12, %v380_v10 }
 0x120   : > { %v394_v23 = vsel %vm393_vm2, %v383_v16, 0.0 }
 0x12a   : > { %v330_v56 = vpop.xlane.xlu0 %329 }
 0x12b   : > { %v331_v58 = vrot.slane %v330_v56, 4 }
 0x12d   : > { %v332_v59 = vadd.f32 %v331_v58, %v330_v56 }
 0x12e   : > { %v356_v60 = vpop.xlane.xlu0 %355 }
 0x12f   : > { %v333_v62 = vrot.slane %v332_v59, 2  ;;  %v357_v63 = vrot.slane %v356_v60, 4 }
 0x131   : > { %v334_v0 = vadd.f32 %v333_v62, %v332_v59  ;;  %v358_v1 = vadd.f32 %v357_v63, %v356_v60 }
 0x133   : > { %v335_v4 = vrot.slane %v334_v0, 1  ;;  %v359_v5 = vrot.slane %v358_v1, 2 }
 0x135   : > { %v336_v6 = vadd.f32 %v335_v4, %v334_v0  ;;  %v360_v7 = vadd.f32 %v359_v5, %v358_v1 }
 0x137   : > { %v361_v11 = vrot.slane %v360_v7, 1  ;;  %v339_v14 = vmul.f32 %v338_v8, %v336_v6 }
 0x139   : > { %v362_v15 = vadd.f32 %v361_v11, %v360_v7  ;;  %v389_v18 = vsel %vm388_vm0, %v339_v14, 0.0 }
 0x13b   : > { %v365_v17 = vmul.f32 %v364_v13, %v362_v15 }
 0x13d   : > { %v384_v19 = vadd.f32 %v365_v17, %v339_v14  ;;  %v391_v20 = vsel %vm390_vm1, %v365_v17, 0.0 }
 0x13e   : > { %v392_v21 = vadd.f32 %v391_v20, %v389_v18 }
 0x13f   : > { %v385_v22 = vadd.f32 %v384_v19, %v383_v16 }
 0x140   : > { %v395_v24 = vadd.f32 %v394_v23, %v392_v21 }
 0x141   : > { %v397_v25 = vsel %vm396_vm3, %v385_v22, 0.0 }
 0x142   : > { %v398_v26 = vadd.f32 %v397_v25, %v395_v24 }
 0x144   : > { %399 = vst [vmem:[%s297_s24] sm:$0x1] %v398_v26 }
 0x145   : > { %735 = shalt.err (!%p732_p3)
}
 0x146   : > { %s736_s26 = scalar_lea.hbm %s411_s28, 16  ;;  %s740_s6 = scalar_lea.hbm %s1081_s4, 32 }
 0x147   : > { %p737_p12 = scmp.ne.s32.totalorder %s411_s28, %s736_s26  ;;  %p741_p7 = scmp.lt.s32.totalorder %s411_s28, %s1081_s4 }
 0x148   : > { %p742_p8 = scmp.lt.s32.totalorder %s740_s6, %s736_s26 }
 0x149   : > { %p738_p2 = pnand %p737_p12, %p1108_p13 }
 0x14a   : > { %p743_p6 = por %p742_p8, %p741_p7 }
 0x14b   : > { %p739_p4 = pneg %p738_p2 }
 0x14d   : > { %p744_p0 = pnand %p743_p6, %p739_p4 }
 0x14f   : > { %747 = shalt.err (!%p744_p0)
}
 0x150   : > { %570 = dma.vmem_to_hbm [thread:$0]  (%p1108_p13), %s414_s25, 16, %s411_s28, %s401_s10  }
 0x151 PF: > { %s425_s12 = sand.u32 1, %s782_s15   ;;  %p1109_p1 = scmp.ne.s32.totalorder %s1098_s5, 0 }
 0x152   : > { %p1110_p5 = scmp.ge.s32.totalorder %s794_s18, 2  ;;  %s426_s8 = scalar_lea.sflag [#allocation4], %s425_s12 }
 0x154   : > { %p587_p9 = pnand %p1110_p5, %p1109_p1 }
 0x156   : > { %p588_p10 = pneg %p587_p9 }
 0x158   : > { %777 = dma.done.wait (%p588_p10), %s426_s8, 16  }
 0x159   : > { %779 = vsyncadd (%p588_p10), %s426_s8, 4294967280  ;;  %s1111_s29 = sld [smem:[#allocation15_spill]]  ;;  %p21_p11 = scmp.ge.s32.totalorder %s847_s19, 4  }
 0x15a   : > { %s1112_s17 = sld [smem:[#allocation16_spill]]  ;;  %s1113_s15 = smov %s786_s16 }
 0x15b   : > { %s1115_s18 = smov %s847_s19  ;;  %23 = sbr.rel (!%p21_p11) target bundleno = 11 (0xb), region = 110 }
 0x15f   : > { %s1114_s16 = smov %s1111_s29 }
 0x160   :  { %430 = vsyncpa [#allocation3], 1 }
 0x161   :  { %432 = vsyncpa [#allocation3 + $0x1], 1 }
 0x162   :  { %433 = vsyncpa [#allocation8], 1 }
 0x163   :  { %435 = vsyncpa [#allocation8 + $0x1], 1 }
 0x164   :  { %436 = vsyncpa [#allocation4], 1 }
 0x165   :  { %438 = vsyncpa [#allocation4 + $0x1], 1 }
 0x166   :  { %439 = vsyncpa [#allocation5], 1 }
 0x167   :  { %441 = vsyncpa [#allocation5 + $0x1], 1 }

</bundles_post_ra>
